<compile_context>
chip_gen: v7x
topology: tpu7x:2x2x1
jax: 0.10.0
libtpu: 0.0.40
codegen_flags: <defaults>
</compile_context>

<pallas_src>
import math
import functools

import jax
import jax.numpy as jnp
from jax import lax
from jax.experimental import pallas as pl
from jax.experimental.pallas import tpu as pltpu


def _cdiv(a, b):
    return -(-a // b)


def _round_up(x, k):
    return ((x + k - 1) // k) * k


# Dense-W path is used whenever W fits comfortably in VMEM.
_DENSE_MAX_N = 2048
_DENSE_MAX_W_BYTES = 8 << 20


# ============================================================================
# Path 1 (default): dense factor-product matmul on the MXU.
#   W folds: all log2(n) butterfly levels per stack, the stack concatenation,
#   the post_process chunk-sum (when r >= 2) and lane padding.
# ============================================================================
def _butterfly_dense_kernel(x_ref, w_ref, b_ref, o_ref):
    o_ref[...] = (
        jnp.dot(x_ref[...], w_ref[...], preferred_element_type=jnp.float32)
        + b_ref[...]).astype(o_ref.dtype)


def _butterfly_dense_pallas(x2d, W, bias2d, *, b_tile):
    batch, n = x2d.shape
    out_cols = W.shape[1]
    grid = (batch // b_tile,)
    # Explicit scoped-VMEM budget (double-buffered tiles + resident W + bias).
    vmem_limit = int(4 * (2 * b_tile * n + 2 * b_tile * out_cols
                          + 2 * n * out_cols + 2 * out_cols)) + (4 << 20)
    vmem_limit = max(16 << 20, min(vmem_limit, 100 << 20))
    return pl.pallas_call(
        _butterfly_dense_kernel,
        out_shape=jax.ShapeDtypeStruct((batch, out_cols), x2d.dtype),
        grid_spec=pltpu.PrefetchScalarGridSpec(
            num_scalar_prefetch=0,
            grid=grid,
            in_specs=[
                pl.BlockSpec((b_tile, n), lambda b: (b, 0)),        # input tile
                pl.BlockSpec((n, out_cols), lambda b: (0, 0)),      # dense W (const)
                pl.BlockSpec((1, out_cols), lambda b: (0, 0)),      # padded bias
            ],
            out_specs=pl.BlockSpec((b_tile, out_cols), lambda b: (b, 0)),
        ),
        compiler_params=pltpu.CompilerParams(
            dimension_semantics=("parallel",),
            vmem_limit_bytes=vmem_limit),
    )(x2d, W, bias2d)


# ============================================================================
# Path 2 (fallback for large n): improved roll/FMA level chain.
# ============================================================================
def _butterfly_roll_kernel(x_ref, t0_ref, t1_ref, mask_ref, bias_ref, o_ref, *,
                           strides, n, nstack, out_ext, out_cols, row_chunk):
    m = len(strides)
    r = (nstack * n) // out_ext

    def process(row):
        x = x_ref[pl.ds(row, row_chunk), :]                      # (rc, n) f32
        if r >= 2:
            acc = jnp.zeros((row_chunk, out_ext), jnp.float32)
        for h in range(nstack):                                  # static, small
            y = x
            for lvl in range(m):                                 # static log2(n)
                s = strides[lvl]
                base = h * m + lvl
                y_minus = pltpu.roll(y, s, axis=1)               # [i] <- y[i - s]
                y_plus = pltpu.roll(y, n - s, axis=1)            # [i] <- y[i + s]
                # tp / tm are disjoint -> single select + 2 mul + 1 add.
                partner = jnp.where(mask_ref[lvl] != 0.0, y_plus, y_minus)
                y = t0_ref[base] * y + t1_ref[base] * partner
            if r >= 2:
                # Fused post_process reduction (only reachable with nstack==1).
                for k in range(n // out_ext):
                    acc = acc + y[:, k * out_ext:(k + 1) * out_ext]
            else:
                # Direct per-stack lane-dense store + fused bias; no concatenate.
                o_ref[pl.ds(row, row_chunk), pl.ds(h * n, n)] = (
                    y + bias_ref[:, pl.ds(h * n, n)]).astype(o_ref.dtype)
        if r >= 2:
            o_ref[pl.ds(row, row_chunk), pl.ds(0, out_ext)] = (
                acc + bias_ref[:, pl.ds(0, out_ext)]).astype(o_ref.dtype)

    nchunks = x_ref.shape[0] // row_chunk
    if nchunks == 1:
        process(0)
    else:
        def body(c, carry):
            process(pl.multiple_of(c * row_chunk, row_chunk))
            return carry
        lax.fori_loop(0, nchunks, body, 0, unroll=(nchunks <= 8))


def _butterfly_roll_pallas(x2d, T0, T1, MASK, bias2d, *, strides, n, nstack,
                           out_ext, out_cols, b_tile, row_chunk):
    batch = x2d.shape[0]
    nm = T0.shape[0]
    m = MASK.shape[0]
    grid = (batch // b_tile,)
    coeff_elems = (2 * nm + m) * 8 * n + 8 * out_cols
    vmem_limit = int(4 * (2 * b_tile * n + 2 * b_tile * out_cols
                          + 2 * coeff_elems)) + (4 << 20)
    vmem_limit = max(16 << 20, min(vmem_limit, 100 << 20))
    kernel = functools.partial(
        _butterfly_roll_kernel, strides=strides, n=n, nstack=nstack,
        out_ext=out_ext, out_cols=out_cols, row_chunk=row_chunk)
    return pl.pallas_call(
        kernel,
        out_shape=jax.ShapeDtypeStruct((batch, out_cols), x2d.dtype),
        grid_spec=pltpu.PrefetchScalarGridSpec(
            num_scalar_prefetch=0,
            grid=grid,
            in_specs=[
                pl.BlockSpec((b_tile, n), lambda b: (b, 0)),          # input tile
                pl.BlockSpec((nm, 8, n), lambda b: (0, 0, 0)),        # T0 (pre-bcast)
                pl.BlockSpec((nm, 8, n), lambda b: (0, 0, 0)),        # T1 (pre-bcast)
                pl.BlockSpec((m, 8, n), lambda b: (0, 0, 0)),         # low-half mask
                pl.BlockSpec((8, out_cols), lambda b: (0, 0)),        # padded bias
            ],
            out_specs=pl.BlockSpec((b_tile, out_cols), lambda b: (b, 0)),
        ),
        compiler_params=pltpu.CompilerParams(
            dimension_semantics=("parallel",),
            vmem_limit_bytes=vmem_limit),
    )(x2d, T0, T1, MASK, bias2d)


# ============================================================================
# Pure-JAX reference (mirrors butterfly_mult_torch tied-weight semantics).
# Also used to build the dense W (butterfly products are linear maps).
# ============================================================================
def _butterfly_mult_ref(twiddle, x, increasing_stride=True):
    batch, nstack, n = x.shape
    m = int(round(math.log2(n)))
    out = x
    levels = range(m) if increasing_stride else list(range(m))[::-1]
    for log_stride in levels:
        s = 1 << log_stride
        t = twiddle[:, s - 1:2 * s - 1]                    # (nstack, s, 2, 2)
        xr = out.reshape(batch, nstack, n // (2 * s), 2, s)
        out = jnp.einsum('hjik,bhckj->bhcij', t, xr)
        out = out.reshape(batch, nstack, n)
    return out


# ----------------------------------------------------------------------------
# Parameter preprocessing
# ----------------------------------------------------------------------------
def _build_dense_matrix(twiddle, n, nstack, increasing_stride, out_ext, out_cols):
    """Dense (n, out_cols) matrix folding all levels + chunk-sum + lane pad."""
    eye = jnp.eye(n, dtype=jnp.float32)
    xr = jnp.broadcast_to(eye[:, None, :], (n, nstack, n))
    y = _butterfly_mult_ref(twiddle, xr, increasing_stride)      # (n, nstack, n)
    W = y.reshape(n, nstack * n)
    r = (nstack * n) // out_ext
    if r >= 2:
        W = W.reshape(n, r, out_ext).sum(axis=1)
    if W.shape[1] < out_cols:
        W = jnp.pad(W, ((0, 0), (0, out_cols - W.shape[1])))
    return W


def _build_level_params_roll(twiddle, n, increasing_stride):
    """Per-level coefficient vectors for the roll/FMA fallback.

    Returns T0, T1 pre-broadcast to 8 sublanes (shape (nstack*m, 8, n)),
    the low-half selection MASK (m, 8, n) and the level strides.
    """
    nstack = twiddle.shape[0]
    m = int(round(math.log2(n)))
    pos = jnp.arange(n)
    levels = list(range(m)) if increasing_stride else list(range(m))[::-1]
    t0s, t1s, masks, strides = [], [], [], []
    for log_stride in levels:
        s = 1 << log_stride
        j = pos % s                         # position within stride
        half = (pos // s) % 2               # which half of the 2s block
        tw = twiddle[:, s - 1:2 * s - 1]                    # (nstack, s, 2, 2)
        t0 = tw[:, j, half, half]                           # coeff on x[p]
        t1 = tw[:, j, half, 1 - half]                       # coeff on x[p ^ s]
        t0s.append(t0)
        t1s.append(t1)
        masks.append((half == 0).astype(jnp.float32))       # 1.0 -> partner at +s
        strides.append(s)
    T0 = jnp.stack(t0s, axis=1).reshape(nstack * m, 1, n)   # row = h*m + lvl
    T1 = jnp.stack(t1s, axis=1).reshape(nstack * m, 1, n)
    T0 = jnp.tile(T0, (1, 8, 1))                            # pre-broadcast sublanes
    T1 = jnp.tile(T1, (1, 8, 1))
    MASK = jnp.tile(jnp.stack(masks, axis=0)[:, None, :], (1, 8, 1))
    return T0, T1, MASK, tuple(strides)


def _pick_batch_tiling(batch, max_tile):
    """Adaptive batch tiling: no mostly-padding last tile; >=2 grid steps when
    batch is big enough so v7x's two TensorCores both get work."""
    n_tiles = _cdiv(batch, max_tile)
    if n_tiles < 2 and batch >= 16:
        n_tiles = 2
    b_tile = _round_up(_cdiv(batch, n_tiles), 8)
    return b_tile, n_tiles


def _clamp_tile(v):
    return max(8, min(512, (v // 8) * 8))


# ----------------------------------------------------------------------------
# Module wrapper (pre/post processing identical to Butterfly.forward)
# ----------------------------------------------------------------------------
class ButterflyPallas:
    def __init__(self, in_size, out_size, key, bias=True, increasing_stride=True,
                 force_roll=False):
        self.in_size = in_size
        self.m = int(math.ceil(math.log2(in_size)))
        self.n = 1 << self.m                                # in_size_extended
        self.out_size = out_size
        self.nstack = int(math.ceil(out_size / self.n))
        self.increasing_stride = increasing_stride
        k_tw, k_b = jax.random.split(key)
        # param='regular', not ortho_init, real:  randn * 1/sqrt(2)
        self.twiddle = (jax.random.normal(k_tw, (self.nstack, self.n - 1, 2, 2),
                                          jnp.float32) / math.sqrt(2.0))
        if bias:
            bound = 1.0 / math.sqrt(in_size)
            self.bias = jax.random.uniform(k_b, (out_size,), jnp.float32,
                                           -bound, bound)
        else:
            self.bias = None

        self.out_ext = 1 << int(math.ceil(math.log2(out_size)))
        r = (self.nstack * self.n) // self.out_ext
        if r >= 2:
            # This branch is only reachable with nstack == 1 and out_ext | n.
            assert self.nstack == 1 and self.n % self.out_ext == 0, \
                "fused chunk-sum requires nstack==1 and out_ext dividing n"
        width = self.out_ext if r >= 2 else self.nstack * self.n
        # Lane-dense output slab: pad to a multiple of 128 (>= 128).
        self.out_cols = max(128, _round_up(width, 128))

        b_vec = self.bias if self.bias is not None else jnp.zeros((out_size,),
                                                                  jnp.float32)
        bias_row = jnp.zeros((self.out_cols,), jnp.float32).at[:out_size].set(b_vec)

        w_bytes = 4 * self.n * self.out_cols
        self.use_dense = (not force_roll and self.n <= _DENSE_MAX_N
                          and w_bytes <= _DENSE_MAX_W_BYTES)
        # Batch-tile cap from a ~8 MiB double-buffered x/out tile budget
        # (safe on v7x's 64 MiB per-TC VMEM and v5e's scoped default).
        self.max_b_tile = _clamp_tile((8 << 20) // (8 * (self.n + self.out_cols)))

        if self.use_dense:
            self.W = _build_dense_matrix(self.twiddle, self.n, self.nstack,
                                         increasing_stride, self.out_ext,
                                         self.out_cols)
            self.bias2d = bias_row[None, :]
        else:
            (self.T0, self.T1, self.MASK, self.strides) = \
                _build_level_params_roll(self.twiddle, self.n, increasing_stride)
            self.bias2d = jnp.tile(bias_row[None, :], (8, 1))   # sublane pre-bcast

    def __call__(self, x):
        in_shape = x.shape
        x2d = x.reshape(-1, self.in_size).astype(jnp.float32)
        if self.in_size != self.n:                         # pre_process pad
            x2d = jnp.pad(x2d, ((0, 0), (0, self.n - self.in_size)))
        batch = x2d.shape[0]

        b_tile, n_tiles = _pick_batch_tiling(batch, self.max_b_tile)
        pad_b = n_tiles * b_tile - batch
        if pad_b:
            x2d = jnp.pad(x2d, ((0, pad_b), (0, 0)))

        if self.use_dense:
            y = _butterfly_dense_pallas(x2d, self.W, self.bias2d, b_tile=b_tile)
        else:
            y = _butterfly_roll_pallas(
                x2d, self.T0, self.T1, self.MASK, self.bias2d,
                strides=self.strides, n=self.n, nstack=self.nstack,
                out_ext=self.out_ext, out_cols=self.out_cols,
                b_tile=b_tile, row_chunk=8)

        y = y[:batch, :self.out_size]                      # bias already fused
        return y.reshape(*in_shape[:-1], self.out_size)


# ----------------------------------------------------------------------------
# Full forward reference (pre/post process + butterfly product)
# ----------------------------------------------------------------------------
def _butterfly_forward_ref(model, x):
    n, nstack = model.n, model.nstack
    in_shape = x.shape
    x2d = x.reshape(-1, model.in_size)
    if model.in_size != n:
        x2d = jnp.pad(x2d, ((0, 0), (0, n - model.in_size)))
    batch = x2d.shape[0]
    xr = jnp.broadcast_to(x2d[:, None, :], (batch, nstack, n))
    y = _butterfly_mult_ref(model.twiddle, xr, model.increasing_stride)
    y = y.reshape(batch, nstack * n)
    out_ext = 1 << int(math.ceil(math.log2(model.out_size)))
    if nstack * n // out_ext >= 2:
        y = y.reshape(batch, nstack * n // out_ext, out_ext).sum(axis=1)
    y = y[:, :model.out_size]
    if model.bias is not None:
        y = y + model.bias
    return y.reshape(*in_shape[:-1], model.out_size)


# ----------------------------------------------------------------------------
if __name__ == "__main__":
    key = jax.random.PRNGKey(0)
    k_x, k_p1, k_p2 = jax.random.split(key, 3)

    # Config A: in=96 -> n=128, out=200 -> nstack=2, lane-dense 256-wide output.
    in_size, out_size = 96, 200
    x = jax.random.normal(k_x, (2, 4, in_size), jnp.float32)
    model_a = ButterflyPallas(in_size, out_size, k_p1, bias=True,
                              increasing_stride=True)
    y_a = model_a(x)
    jax.block_until_ready(y_a)
    y_a_ref = _butterfly_forward_ref(model_a, x)
    assert y_a.shape == (2, 4, out_size), y_a.shape
    assert jnp.allclose(y_a, y_a_ref, atol=1e-4, rtol=1e-4), \
        float(jnp.max(jnp.abs(y_a - y_a_ref)))

    # Config B: out=40 -> out_ext=64 (< 128, padded lane-dense), chunk-sum path,
    # decreasing stride order.
    in_size_b, out_size_b = 96, 40
    x_b = jax.random.normal(k_x, (3, in_size_b), jnp.float32)
    model_b = ButterflyPallas(in_size_b, out_size_b, k_p2, bias=True,
                              increasing_stride=False)
    y_b = model_b(x_b)
    jax.block_until_ready(y_b)
    y_b_ref = _butterfly_forward_ref(model_b, x_b)
    assert y_b.shape == (3, out_size_b), y_b.shape
    assert jnp.allclose(y_b, y_b_ref, atol=1e-4, rtol=1e-4), \
        float(jnp.max(jnp.abs(y_b - y_b_ref)))

    # Config C: larger batch (160 rows) -> adaptive 2-step grid.
    x_c = jax.random.normal(k_x, (8, 20, in_size), jnp.float32)
    y_c = model_a(x_c)
    jax.block_until_ready(y_c)
    y_c_ref = _butterfly_forward_ref(model_a, x_c)
    assert y_c.shape == (8, 20, out_size), y_c.shape
    assert jnp.allclose(y_c, y_c_ref, atol=1e-4, rtol=1e-4), \
        float(jnp.max(jnp.abs(y_c - y_c_ref)))

    # Configs D/E: force the roll/FMA fallback kernel (large-n path) on the same
    # parameters to validate it independently of the dense-W construction.
    model_d = ButterflyPallas(in_size, out_size, k_p1, bias=True,
                              increasing_stride=True, force_roll=True)
    y_d = model_d(x)
    jax.block_until_ready(y_d)
    assert jnp.allclose(y_d, y_a_ref, atol=1e-4, rtol=1e-4), \
        float(jnp.max(jnp.abs(y_d - y_a_ref)))

    model_e = ButterflyPallas(in_size_b, out_size_b, k_p2, bias=True,
                              increasing_stride=False, force_roll=True)
    y_e = model_e(x_b)
    jax.block_until_ready(y_e)
    assert jnp.allclose(y_e, y_b_ref, atol=1e-4, rtol=1e-4), \
        float(jnp.max(jnp.abs(y_e - y_b_ref)))

    print("KERNEL_OK")
</pallas_src>

<mosaic_0001>
module attributes {stable_mosaic.version = 11 : i64} {
  func.func @_butterfly_dense_kernel(%arg0: i32, %arg1: memref<8x128xf32, #tpu.memory_space<vmem>>, %arg2: memref<128x256xf32, #tpu.memory_space<vmem>>, %arg3: memref<1x256xf32, #tpu.memory_space<vmem>>, %arg4: memref<8x256xf32, #tpu.memory_space<vmem>>) attributes {dimension_semantics = [#tpu.dimension_semantics<parallel>], iteration_bounds = array<i64: 1>, scalar_prefetch = 0 : i64, scratch_operands = 0 : i64, tpu.core_type = #tpu.core_type<tc>, window_params = [{transform_indices = @transform_0, window_bounds = array<i64: 8, 128>}, {pipeline_mode = #tpu.pipeline_mode<synchronous>, transform_indices = @transform_1, window_bounds = array<i64: 128, 256>}, {pipeline_mode = #tpu.pipeline_mode<synchronous>, transform_indices = @transform_2, window_bounds = array<i64: 1, 256>}, {transform_indices = @transform_3, window_bounds = array<i64: 8, 256>}]} {
    %c0 = arith.constant 0 : index
    %c0_0 = arith.constant 0 : index
    %0 = vector.load %arg1[%c0, %c0_0] : memref<8x128xf32, #tpu.memory_space<vmem>>, vector<8x128xf32>
    %c0_1 = arith.constant 0 : index
    %c0_2 = arith.constant 0 : index
    %1 = vector.load %arg2[%c0_1, %c0_2] : memref<128x256xf32, #tpu.memory_space<vmem>>, vector<128x256xf32>
    %cst = arith.constant dense<0.000000e+00> : vector<8x256xf32>
    %2 = tpu.matmul %0, %1, %cst {dimension_numbers = #tpu.dot_dimension_numbers<[1], [0], [0], [1], [0, 0, 1, 1], [], []>} : vector<8x128xf32>, vector<128x256xf32>, vector<8x256xf32> -> vector<8x256xf32>
    %c0_3 = arith.constant 0 : index
    %c0_4 = arith.constant 0 : index
    %3 = vector.load %arg3[%c0_3, %c0_4] : memref<1x256xf32, #tpu.memory_space<vmem>>, vector<1x256xf32>
    %4 = vector.broadcast %3 : vector<1x256xf32> to vector<8x256xf32>
    %5 = arith.addf %2, %4 : vector<8x256xf32>
    %c0_5 = arith.constant 0 : index
    %c0_6 = arith.constant 0 : index
    %6 = vector.load %arg4[%c0_5, %c0_6] : memref<8x256xf32, #tpu.memory_space<vmem>>, vector<8x256xf32>
    tpu.vector_store %arg4[%c0_5, %c0_6], %5 {strides = array<i32>} : memref<8x256xf32, #tpu.memory_space<vmem>>, vector<8x256xf32>,
    return
  }
  func.func @transform_0(%arg0: i32) -> (i32, i32) {
    %c0_i32 = arith.constant 0 : i32
    %c0_i32_0 = arith.constant 0 : i32
    return %arg0, %c0_i32 : i32, i32
  }
  func.func @transform_1(%arg0: i32) -> (i32, i32) {
    %c0_i32 = arith.constant 0 : i32
    %c0_i32_0 = arith.constant 0 : i32
    %c0_i32_1 = arith.constant 0 : i32
    return %c0_i32, %c0_i32_0 : i32, i32
  }
  func.func @transform_2(%arg0: i32) -> (i32, i32) {
    %c0_i32 = arith.constant 0 : i32
    %c0_i32_0 = arith.constant 0 : i32
    %c0_i32_1 = arith.constant 0 : i32
    return %c0_i32, %c0_i32_0 : i32, i32
  }
  func.func @transform_3(%arg0: i32) -> (i32, i32) {
    %c0_i32 = arith.constant 0 : i32
    %c0_i32_0 = arith.constant 0 : i32
    return %arg0, %c0_i32 : i32, i32
  }
}

</mosaic_0001>

<bundles_post_ra>
// kernel: tpu_custom_call.1
= control target key start
LH: loop header
LB: loop body
LE: loop exit
PB: predicated region body
PF: predicated region fallthrough
CT: control target
= control target key end

     0   :  { %8 = vsyncpa [#allocation3], 0  ;;  %s357_s0 = inlined_call_operand.hbm [shape: f32[8,128], index: 0, kind: input, shape index: {}]   ;;  %s358_s1 = inlined_call_operand.hbm [shape: f32[128,256], index: 1, kind: input, shape index: {}]   ;;  %s359_s2 = inlined_call_operand.vmem [shape: f32[1,256], index: 2, kind: input, shape index: {}]   ;;  %s360_s3 = inlined_call_operand.hbm [shape: f32[8,256], index: 3, kind: output, shape index: {}]  }
   0x1   :  { %9 = vsyncpa [#allocation6], 0 }
   0x2   :  { %10 = vsyncpa [#allocation4], 0  ;;  %s285_s12 = smov [#allocation2]   ;;  %s286_s14 = smov [#allocation5]  }
   0x3   :  { %s17_s13 = sshll.u32 %s285_s12, 4  ;;  %s26_s15 = sshll.u32 %s286_s14, 4  ;;  %s18_s13 = int_to_ptr.vmem [resolvable:$true] %s17_s13  ;;  %s311_s15 = int_to_ptr.vmem [resolvable:$true] %s26_s15 }
   0x4   :  { %s213_s18 = scalar_lea.hbm %s357_s0, 128 }
   0x5   :  { %p214_p0 = scmp.ne.s32.totalorder %s357_s0, %s213_s18  ;;  %p217_p1 = scmp.lt.u32.totalorder %s213_s18, %s357_s0 }
   0x7   :  { %p219_p2 = pnand %p217_p1, %p214_p0 }
   0x9   :  { %222 = shalt.err (!%p219_p2)
}
   0xa   :  { %s223_s23 = scalar_lea.vmem %s18_s13, 128  ;;  %p228_p4 = scmp.lt.s32.totalorder %s18_s13, %s18_s13 }
   0xb   :  { %p224_p3 = scmp.ne.s32.totalorder %s18_s13, %s223_s23  ;;  %p229_p5 = scmp.lt.s32.totalorder %s223_s23, %s223_s23 }
   0xd   :  { %p230_p6 = por %p229_p5, %p228_p4 }
   0xf   :  { %p231_p7 = pnand %p230_p6, %p224_p3 }
  0x11   :  { %234 = shalt.err (!%p231_p7)
}
  0x12   :  { %20 = dma.hbm_to_vmem [thread:$0]  %s357_s0, 128, %s18_s13, [#allocation3]  }
  0x13   :  { %s235_s28 = scalar_lea.hbm %s358_s1, 4096 }
  0x14   :  { %p236_p8 = scmp.ne.s32.totalorder %s358_s1, %s235_s28  ;;  %p239_p9 = scmp.lt.u32.totalorder %s235_s28, %s358_s1 }
  0x16   :  { %p241_p10 = pnand %p239_p9, %p236_p8 }
  0x18   :  { %244 = shalt.err (!%p241_p10)
}
  0x19   :  { %s245_s6 = scalar_lea.vmem %s311_s15, 4096  ;;  %p250_p12 = scmp.lt.s32.totalorder %s311_s15, %s311_s15 }
  0x1a   :  { %p246_p11 = scmp.ne.s32.totalorder %s311_s15, %s245_s6  ;;  %p251_p13 = scmp.lt.s32.totalorder %s245_s6, %s245_s6 }
  0x1c   :  { %p252_p0 = por %p251_p13, %p250_p12 }
  0x1e   :  { %p253_p1 = pnand %p252_p0, %p246_p11 }
  0x20   :  { %256 = shalt.err (!%p253_p1)
}
  0x21   :  { %s287_s0 = smov 256   ;;  %s288_s7 = smov 16  }
  0x22   :  { %32 = dma.hbm_to_vmem [thread:$0]  %s358_s1, 4096, %s311_s15, [#allocation6], %s287_s0, %s287_s0, %s288_s7  }
  0x23   :  { %279 = dma.done.wait [#allocation3], 128  }
  0x24   :  { %280 = vsyncadd [#allocation3], 4294967168 }
  0x25   :  { %281 = dma.done.wait [#allocation6], 4096  }
  0x26   :  { %282 = vsyncadd [#allocation6], 4294963200  ;;  %v289_v0 = vmov 0.0   ;;  %v43_v1 = vld [vmem:[#allocation5 + $0x8] sm:$0xff]  ;;  %v45_v2 = vld [vmem:[#allocation5 + $0x18] sm:$0xff]  ;;  %v76_v50 = vlaneseq  ;;  %s290_s11 = smov [#allocation7]  }
  0x27   :  { %150 = vmatprep.mubr.f32.mxu0 %v289_v0  ;;  %v42_v3 = vld [vmem:[#allocation5] sm:$0xff]  ;;  %v175_v4 = vpack.c.bf16 %v45_v2, %v43_v1  ;;  %v44_v5 = vld [vmem:[#allocation5 + $0x10] sm:$0xff]  ;;  %v47_v6 = vld [vmem:[#allocation5 + $0x28] sm:$0xff]  ;;  %s165_s12 = sshll.u32 %s290_s11, 4  ;;  %s166_s12 = int_to_ptr.vmem [resolvable:$true] %s165_s12 }
  0x28   :  { %v49_v7 = vld [vmem:[#allocation5 + $0x38] sm:$0xff]  ;;  %v177_v8 = vpack.c.bf16 %v44_v5, %v42_v3  ;;  %v46_v10 = vld [vmem:[#allocation5 + $0x20] sm:$0xff]  ;;  %v48_v11 = vld [vmem:[#allocation5 + $0x30] sm:$0xff]  ;;  %v77_v51 = vshrl.u32 %v76_v50, 7  ;;  %s257_s13 = scalar_lea.vmem %s166_s12, 256  ;;  %p262_p3 = scmp.lt.s32.totalorder %s166_s12, %s166_s12 }
  0x29   :  { %v179_v9 = vpack.c.bf16 %v49_v7, %v47_v6  ;;  %v51_v12 = vld [vmem:[#allocation5 + $0x48] sm:$0xff]  ;;  %176 = vmatprep.subr.bf16.mxu0 %v175_v4  ;;  %v53_v13 = vld [vmem:[#allocation5 + $0x58] sm:$0xff]  ;;  %v181_v14 = vpack.c.bf16 %v48_v11, %v46_v10  ;;  %v50_v16 = vld [vmem:[#allocation5 + $0x40] sm:$0xff]  ;;  %p258_p2 = scmp.ne.s32.totalorder %s166_s12, %s257_s13  ;;  %p263_p4 = scmp.lt.s32.totalorder %s257_s13, %s257_s13 }
  0x2a   :  { %178 = vmatpush1.bf16.msra.mxu0 %v177_v8  ;;  %v183_v15 = vpack.c.bf16 %v53_v13, %v51_v12  ;;  %v52_v17 = vld [vmem:[#allocation5 + $0x50] sm:$0xff]  ;;  %v55_v18 = vld [vmem:[#allocation5 + $0x68] sm:$0xff]  ;;  %v57_v19 = vld [vmem:[#allocation5 + $0x78] sm:$0xff]  ;;  %v78_v52 = vsub.s32 0, %v77_v51  ;;  %v82_v54 = vsub.s32 1, %v77_v51 }
  0x2b   :  { %180 = vmatprep.subr.bf16.mxu0 %v179_v9  ;;  %v185_v20 = vpack.c.bf16 %v52_v17, %v50_v16  ;;  %v187_v21 = vpack.c.bf16 %v57_v19, %v55_v18  ;;  %v54_v22 = vld [vmem:[#allocation5 + $0x60] sm:$0xff]  ;;  %v56_v23 = vld [vmem:[#allocation5 + $0x70] sm:$0xff]  ;;  %v59_v24 = vld [vmem:[#allocation5 + $0x88] sm:$0xff]  ;;  %p264_p5 = por %p263_p4, %p262_p3 }
  0x2c   :  { %v61_v25 = vld [vmem:[#allocation5 + $0x98] sm:$0xff]  ;;  %v189_v26 = vpack.c.bf16 %v56_v23, %v54_v22  ;;  %v58_v28 = vld [vmem:[#allocation5 + $0x80] sm:$0xff]  ;;  %v60_v29 = vld [vmem:[#allocation5 + $0x90] sm:$0xff] }
  0x2d   :  { %v191_v27 = vpack.c.bf16 %v61_v25, %v59_v24  ;;  %v63_v30 = vld [vmem:[#allocation5 + $0xa8] sm:$0xff]  ;;  %v65_v31 = vld [vmem:[#allocation5 + $0xb8] sm:$0xff]  ;;  %v193_v32 = vpack.c.bf16 %v60_v29, %v58_v28  ;;  %v62_v34 = vld [vmem:[#allocation5 + $0xa0] sm:$0xff]  ;;  %p265_p6 = pnand %p264_p5, %p258_p2 }
  0x2e   :  { %182 = vmatpush1.bf16.msra.mxu0 %v181_v14  ;;  %v195_v33 = vpack.c.bf16 %v65_v31, %v63_v30  ;;  %v64_v35 = vld [vmem:[#allocation5 + $0xb0] sm:$0xff]  ;;  %v67_v36 = vld [vmem:[#allocation5 + $0xc8] sm:$0xff]  ;;  %v69_v37 = vld [vmem:[#allocation5 + $0xd8] sm:$0xff] }
  0x2f   :  { %184 = vmatprep.subr.bf16.mxu0 %v183_v15  ;;  %v197_v38 = vpack.c.bf16 %v64_v35, %v62_v34  ;;  %v199_v39 = vpack.c.bf16 %v69_v37, %v67_v36  ;;  %v66_v40 = vld [vmem:[#allocation5 + $0xc0] sm:$0xff]  ;;  %v68_v41 = vld [vmem:[#allocation5 + $0xd0] sm:$0xff]  ;;  %v71_v42 = vld [vmem:[#allocation5 + $0xe8] sm:$0xff] }
  0x30   :  { %v73_v43 = vld [vmem:[#allocation5 + $0xf8] sm:$0xff]  ;;  %v201_v44 = vpack.c.bf16 %v68_v41, %v66_v40  ;;  %v70_v46 = vld [vmem:[#allocation5 + $0xe0] sm:$0xff]  ;;  %v72_v47 = vld [vmem:[#allocation5 + $0xf0] sm:$0xff] }
  0x31   :  { %v203_v45 = vpack.c.bf16 %v73_v43, %v71_v42  ;;  %v205_v48 = vpack.c.bf16 %v72_v47, %v70_v46  ;;  %v41_v49 = vld [vmem:[#allocation2] sm:$0xff] }
  0x32   :  { %186 = vmatpush1.bf16.msra.mxu0 %v185_v20  ;;  %v74_v53 = vld [vmem:[%s359_s2] sm:$0x3] }
  0x33   :  { %188 = vmatprep.subr.bf16.mxu0 %v187_v21  ;;  %v79_v55 = vrot.slane %v74_v53, %v78_v52  ;;  %v83_v56 = vrot.slane %v74_v53, %v82_v54 }
  0x36   :  { %190 = vmatpush1.bf16.msra.mxu0 %v189_v26 }
  0x37   :  { %192 = vmatprep.subr.bf16.mxu0 %v191_v27 }
  0x3a   :  { %194 = vmatpush1.bf16.msra.mxu0 %v193_v32 }
  0x3b   :  { %196 = vmatprep.subr.bf16.mxu0 %v195_v33 }
  0x3e   :  { %198 = vmatpush1.bf16.msra.mxu0 %v197_v38 }
  0x3f   :  { %200 = vmatprep.subr.bf16.mxu0 %v199_v39 }
  0x42   :  { %202 = vmatpush1.bf16.msra.mxu0 %v201_v44 }
  0x43   :  { %204 = vmatprep.subr.bf16.mxu0 %v203_v45 }
  0x46   :  { %206 = vmatpush1.bf16.msra.mxu0 %v205_v48 }
  0x49   :  { %151 = vmatmul.mubr.f32.vlgmr.msra.gmra.mrb[0].mxu0 %v41_v49 }
 0x11c   :  { %v152_v57 = vpop.f32.mrb[0].mxu0 }
 0x11d   :  { %v153_v58 = vadd.f32 %v152_v57, %v79_v55  ;;  %v154_v59 = vpop.f32.mrb[1].mxu0 }
 0x11e   :  { %v155_v60 = vadd.f32 %v154_v59, %v83_v56 }
 0x11f   :  { %157 = vst [vmem:[#allocation7] sm:$0xff] %v153_v58 }
 0x120   :  { %158 = vst [vmem:[#allocation7 + $0x8] sm:$0xff] %v155_v60 }
 0x121   :  { %268 = shalt.err (!%p265_p6)
}
 0x122   :  { %s269_s15 = scalar_lea.hbm %s360_s3, 256 }
 0x123   :  { %p270_p7 = scmp.ne.s32.totalorder %s360_s3, %s269_s15  ;;  %p273_p8 = scmp.lt.u32.totalorder %s269_s15, %s360_s3 }
 0x125   :  { %p275_p9 = pnand %p273_p8, %p270_p7 }
 0x127   :  { %278 = shalt.err (!%p275_p9)
}
 0x128   :  { %168 = dma.vmem_to_hbm [thread:$0]  %s166_s12, 256, %s360_s3, [#allocation4]  }
 0x129   :  { %283 = dma.done.wait [#allocation4], 256  }
 0x12a   :  { %284 = vsyncadd [#allocation4], 4294967040 }
 0x12b   :  { %172 = vsyncpa [#allocation3], 1 }
 0x12c   :  { %173 = vsyncpa [#allocation6], 1 }
 0x12d   :  { %174 = vsyncpa [#allocation4], 1 }

</bundles_post_ra>
